<compile_context>
chip_gen: v7x
topology: tpu7x:2x2x1
jax: 0.10.0
libtpu: 0.0.40
codegen_flags: <defaults>
</compile_context>

<pallas_src>
import jax
import jax.numpy as jnp
from jax import lax
from jax.experimental import pallas as pl
from jax.experimental.pallas import tpu as pltpu

IN_FEATURES = 4096
OUT_FEATURES = 1
_MAX_TB = 1024          # 1024 rows * 4096 f32 = 16 MiB block; 32 MiB double-buffered
_K_CHUNK = 512          # feature-axis strip width (4 lane tiles)
_N_CHUNKS = IN_FEATURES // _K_CHUNK   # 8


def _linreg_relu_kernel(x_ref, w_ref, b_ref, o_ref):
    # x_ref: (TB, 4096) VMEM, w_ref: (1, 4096) VMEM, b_ref: (1, 1) SMEM,
    # o_ref: (1, TB) VMEM (lane-dense batch axis).
    tb = x_ref.shape[0]

    def body(c, acc):
        off = pl.multiple_of(c * _K_CHUNK, _K_CHUNK)
        xk = x_ref[:, pl.ds(off, _K_CHUNK)].astype(jnp.float32)
        wk = w_ref[:, pl.ds(off, _K_CHUNK)].astype(jnp.float32)
        return acc + xk * wk                      # VPU, weight bcast over sublanes

    acc = lax.fori_loop(0, _N_CHUNKS, body,
                        jnp.zeros((tb, _K_CHUNK), jnp.float32), unroll=True)
    s = jnp.sum(acc, axis=-1)                     # single XLU lane reduce -> (tb,)
    out = jnp.maximum(s + b_ref[0, 0], 0.0)       # bias + ReLU on VPU
    o_ref[...] = out[None, :].astype(o_ref.dtype)  # lane-dense store


def _choose_tile(B):
    """Pick (tb, num_tiles) with no input padding.

    * B <= 128: a single block equal to the full array (any B is legal, no OOB).
    * B  > 128: tb is a multiple of 128 (lane-aligned output blocks) chosen so
      the grid has >= 2 tiles (v7x megacore) but never exceeds _MAX_TB.
    """
    if B <= 128:
        return B, 1
    tb = min(_MAX_TB, ((pl.cdiv(B, 2) + 127) // 128) * 128)
    return tb, pl.cdiv(B, tb)


def linear_regression_forward(x, weight, bias):
    """x: [B, 4096], weight: [1, 4096] (PyTorch layout), bias: [1].

    Returns ReLU(x @ weight.T + bias) with shape [B, 1].
    """
    B = x.shape[0]
    assert x.shape[1] == IN_FEATURES

    tb, num_tiles = _choose_tile(B)
    b_out = num_tiles * tb                        # output width (>= B), sliced below

    bias_smem = jnp.asarray(bias, jnp.float32).reshape(1, 1)

    # Size the scoped-VMEM budget from the tile: x double-buffer + headroom for
    # the weight / accumulator / output.  Stays well under v7x's 64 MiB.
    itemsize = jnp.dtype(x.dtype).itemsize
    vmem_limit = max(16 << 20, min(2 * tb * IN_FEATURES * itemsize + (8 << 20),
                                   56 << 20))

    out = pl.pallas_call(
        _linreg_relu_kernel,
        out_shape=jax.ShapeDtypeStruct((1, b_out), x.dtype),
        grid=(num_tiles,),
        in_specs=[
            # x: one (TB, 4096) batch tile per grid step (pipelined, ragged
            # boundary block clamped by Pallas -- no wrapper padding).
            pl.BlockSpec((tb, IN_FEATURES), lambda i: (i, 0)),
            # weight: constant index_map -> stays VMEM-resident across steps.
            pl.BlockSpec((OUT_FEATURES, IN_FEATURES), lambda i: (0, 0)),
            # bias: scalar in SMEM.
            pl.BlockSpec(memory_space=pltpu.MemorySpace.SMEM),
        ],
        # Lane-dense output: (1, TB) per step along the lane axis.
        out_specs=pl.BlockSpec((1, tb), lambda i: (0, i)),
        compiler_params=pltpu.CompilerParams(
            dimension_semantics=("parallel",),
            vmem_limit_bytes=vmem_limit,
        ),
    )(x, weight, bias_smem)

    # Lanes >= B correspond to the ragged / unused tail: never read them.
    return out[0, :B].reshape(B, OUT_FEATURES)


def init_params(key):
    # Mimic torch.nn.Linear default init: U(-1/sqrt(in), 1/sqrt(in)).
    kw, kb = jax.random.split(key)
    bound = 1.0 / (IN_FEATURES ** 0.5)
    weight = jax.random.uniform(
        kw, (OUT_FEATURES, IN_FEATURES), jnp.float32, -bound, bound
    )
    bias = jax.random.uniform(kb, (OUT_FEATURES,), jnp.float32, -bound, bound)
    return weight, bias


if __name__ == "__main__":
    key = jax.random.PRNGKey(0)
    kx, kx2, kp = jax.random.split(key, 3)

    weight, bias = init_params(kp)

    # Small-batch check (single full-array block, B=2, no padding anywhere).
    B = 2
    x = jax.random.normal(kx, (B, IN_FEATURES), dtype=jnp.float32)
    out = jax.block_until_ready(linear_regression_forward(x, weight, bias))
    ref = jnp.maximum(x @ weight.T + bias, 0.0)
    assert out.shape == (B, OUT_FEATURES)
    assert jnp.allclose(out, ref, atol=1e-4, rtol=1e-4)

    # Ragged multi-tile check (tb=256, grid=(2,), second block partially OOB)
    # exercising the pad-free boundary path + two-tile (megacore) split.
    B2 = 300
    x2 = jax.random.normal(kx2, (B2, IN_FEATURES), dtype=jnp.float32)
    out2 = jax.block_until_ready(linear_regression_forward(x2, weight, bias))
    ref2 = jnp.maximum(x2 @ weight.T + bias, 0.0)
    assert out2.shape == (B2, OUT_FEATURES)
    assert jnp.allclose(out2, ref2, atol=1e-4, rtol=1e-4)

    print("KERNEL_OK")
</pallas_src>

<mosaic_0001>
module attributes {stable_mosaic.version = 11 : i64} {
  func.func @_linreg_relu_kernel(%arg0: i32, %arg1: memref<2x4096xf32, #tpu.memory_space<vmem>>, %arg2: memref<1x4096xf32, #tpu.memory_space<vmem>>, %arg3: memref<1x1xf32, #tpu.memory_space<smem>>, %arg4: memref<1x2xf32, #tpu.memory_space<vmem>>) attributes {dimension_semantics = [#tpu.dimension_semantics<parallel>], iteration_bounds = array<i64: 1>, scalar_prefetch = 0 : i64, scratch_operands = 0 : i64, tpu.core_type = #tpu.core_type<tc>, window_params = [{transform_indices = @transform_0, window_bounds = array<i64: 2, 4096>}, {pipeline_mode = #tpu.pipeline_mode<synchronous>, transform_indices = @transform_1, window_bounds = array<i64: 1, 4096>}, {transform_indices = @transform_2, window_bounds = array<i64: 1, 1>}, {transform_indices = @transform_3, window_bounds = array<i64: 1, 2>}]} {
    %cst = arith.constant 0.000000e+00 : f32
    %0 = vector.broadcast %cst : f32 to vector<2x512xf32>
    %c0_i32 = arith.constant 0 : i32
    %c512_i32 = arith.constant 512 : i32
    %1 = arith.muli %c0_i32, %c512_i32 : i32
    %2 = tpu.assume_multiple %1, 512 : i32
    %c0 = arith.constant 0 : index
    %3 = arith.index_cast %2 : i32 to index
    %4 = vector.load %arg1[%c0, %3] : memref<2x4096xf32, #tpu.memory_space<vmem>>, vector<2x512xf32>
    %c0_0 = arith.constant 0 : index
    %5 = arith.index_cast %2 : i32 to index
    %6 = vector.load %arg2[%c0_0, %5] : memref<1x4096xf32, #tpu.memory_space<vmem>>, vector<1x512xf32>
    %7 = vector.broadcast %6 : vector<1x512xf32> to vector<2x512xf32>
    %8 = arith.mulf %4, %7 : vector<2x512xf32>
    %9 = arith.addf %0, %8 : vector<2x512xf32>
    %c1_i32 = arith.constant 1 : i32
    %c512_i32_1 = arith.constant 512 : i32
    %10 = arith.muli %c1_i32, %c512_i32_1 : i32
    %11 = tpu.assume_multiple %10, 512 : i32
    %c0_2 = arith.constant 0 : index
    %12 = arith.index_cast %11 : i32 to index
    %13 = vector.load %arg1[%c0_2, %12] : memref<2x4096xf32, #tpu.memory_space<vmem>>, vector<2x512xf32>
    %c0_3 = arith.constant 0 : index
    %14 = arith.index_cast %11 : i32 to index
    %15 = vector.load %arg2[%c0_3, %14] : memref<1x4096xf32, #tpu.memory_space<vmem>>, vector<1x512xf32>
    %16 = vector.broadcast %15 : vector<1x512xf32> to vector<2x512xf32>
    %17 = arith.mulf %13, %16 : vector<2x512xf32>
    %18 = arith.addf %9, %17 : vector<2x512xf32>
    %c2_i32 = arith.constant 2 : i32
    %c512_i32_4 = arith.constant 512 : i32
    %19 = arith.muli %c2_i32, %c512_i32_4 : i32
    %20 = tpu.assume_multiple %19, 512 : i32
    %c0_5 = arith.constant 0 : index
    %21 = arith.index_cast %20 : i32 to index
    %22 = vector.load %arg1[%c0_5, %21] : memref<2x4096xf32, #tpu.memory_space<vmem>>, vector<2x512xf32>
    %c0_6 = arith.constant 0 : index
    %23 = arith.index_cast %20 : i32 to index
    %24 = vector.load %arg2[%c0_6, %23] : memref<1x4096xf32, #tpu.memory_space<vmem>>, vector<1x512xf32>
    %25 = vector.broadcast %24 : vector<1x512xf32> to vector<2x512xf32>
    %26 = arith.mulf %22, %25 : vector<2x512xf32>
    %27 = arith.addf %18, %26 : vector<2x512xf32>
    %c3_i32 = arith.constant 3 : i32
    %c512_i32_7 = arith.constant 512 : i32
    %28 = arith.muli %c3_i32, %c512_i32_7 : i32
    %29 = tpu.assume_multiple %28, 512 : i32
    %c0_8 = arith.constant 0 : index
    %30 = arith.index_cast %29 : i32 to index
    %31 = vector.load %arg1[%c0_8, %30] : memref<2x4096xf32, #tpu.memory_space<vmem>>, vector<2x512xf32>
    %c0_9 = arith.constant 0 : index
    %32 = arith.index_cast %29 : i32 to index
    %33 = vector.load %arg2[%c0_9, %32] : memref<1x4096xf32, #tpu.memory_space<vmem>>, vector<1x512xf32>
    %34 = vector.broadcast %33 : vector<1x512xf32> to vector<2x512xf32>
    %35 = arith.mulf %31, %34 : vector<2x512xf32>
    %36 = arith.addf %27, %35 : vector<2x512xf32>
    %c4_i32 = arith.constant 4 : i32
    %c512_i32_10 = arith.constant 512 : i32
    %37 = arith.muli %c4_i32, %c512_i32_10 : i32
    %38 = tpu.assume_multiple %37, 512 : i32
    %c0_11 = arith.constant 0 : index
    %39 = arith.index_cast %38 : i32 to index
    %40 = vector.load %arg1[%c0_11, %39] : memref<2x4096xf32, #tpu.memory_space<vmem>>, vector<2x512xf32>
    %c0_12 = arith.constant 0 : index
    %41 = arith.index_cast %38 : i32 to index
    %42 = vector.load %arg2[%c0_12, %41] : memref<1x4096xf32, #tpu.memory_space<vmem>>, vector<1x512xf32>
    %43 = vector.broadcast %42 : vector<1x512xf32> to vector<2x512xf32>
    %44 = arith.mulf %40, %43 : vector<2x512xf32>
    %45 = arith.addf %36, %44 : vector<2x512xf32>
    %c5_i32 = arith.constant 5 : i32
    %c512_i32_13 = arith.constant 512 : i32
    %46 = arith.muli %c5_i32, %c512_i32_13 : i32
    %47 = tpu.assume_multiple %46, 512 : i32
    %c0_14 = arith.constant 0 : index
    %48 = arith.index_cast %47 : i32 to index
    %49 = vector.load %arg1[%c0_14, %48] : memref<2x4096xf32, #tpu.memory_space<vmem>>, vector<2x512xf32>
    %c0_15 = arith.constant 0 : index
    %50 = arith.index_cast %47 : i32 to index
    %51 = vector.load %arg2[%c0_15, %50] : memref<1x4096xf32, #tpu.memory_space<vmem>>, vector<1x512xf32>
    %52 = vector.broadcast %51 : vector<1x512xf32> to vector<2x512xf32>
    %53 = arith.mulf %49, %52 : vector<2x512xf32>
    %54 = arith.addf %45, %53 : vector<2x512xf32>
    %c6_i32 = arith.constant 6 : i32
    %c512_i32_16 = arith.constant 512 : i32
    %55 = arith.muli %c6_i32, %c512_i32_16 : i32
    %56 = tpu.assume_multiple %55, 512 : i32
    %c0_17 = arith.constant 0 : index
    %57 = arith.index_cast %56 : i32 to index
    %58 = vector.load %arg1[%c0_17, %57] : memref<2x4096xf32, #tpu.memory_space<vmem>>, vector<2x512xf32>
    %c0_18 = arith.constant 0 : index
    %59 = arith.index_cast %56 : i32 to index
    %60 = vector.load %arg2[%c0_18, %59] : memref<1x4096xf32, #tpu.memory_space<vmem>>, vector<1x512xf32>
    %61 = vector.broadcast %60 : vector<1x512xf32> to vector<2x512xf32>
    %62 = arith.mulf %58, %61 : vector<2x512xf32>
    %63 = arith.addf %54, %62 : vector<2x512xf32>
    %c7_i32 = arith.constant 7 : i32
    %c512_i32_19 = arith.constant 512 : i32
    %64 = arith.muli %c7_i32, %c512_i32_19 : i32
    %65 = tpu.assume_multiple %64, 512 : i32
    %c0_20 = arith.constant 0 : index
    %66 = arith.index_cast %65 : i32 to index
    %67 = vector.load %arg1[%c0_20, %66] : memref<2x4096xf32, #tpu.memory_space<vmem>>, vector<2x512xf32>
    %c0_21 = arith.constant 0 : index
    %68 = arith.index_cast %65 : i32 to index
    %69 = vector.load %arg2[%c0_21, %68] : memref<1x4096xf32, #tpu.memory_space<vmem>>, vector<1x512xf32>
    %70 = vector.broadcast %69 : vector<1x512xf32> to vector<2x512xf32>
    %71 = arith.mulf %67, %70 : vector<2x512xf32>
    %72 = arith.addf %63, %71 : vector<2x512xf32>
    %c8_i32 = arith.constant 8 : i32
    %cst_22 = arith.constant dense<0.000000e+00> : vector<2xf32>
    %73 = vector.multi_reduction <add>, %72, %cst_22 [1] : vector<2x512xf32> to vector<2xf32>
    %c0_23 = arith.constant 0 : index
    %c0_24 = arith.constant 0 : index
    %74 = memref.load %arg3[%c0_23, %c0_24] : memref<1x1xf32, #tpu.memory_space<smem>>
    %75 = vector.broadcast %74 : f32 to vector<2xf32>
    %76 = arith.addf %73, %75 : vector<2xf32>
    %cst_25 = arith.constant 0.000000e+00 : f32
    %77 = vector.broadcast %cst_25 : f32 to vector<2xf32>
    %78 = arith.maximumf %76, %77 : vector<2xf32>
    %79 = vector.shape_cast %78 : vector<2xf32> to vector<1x2xf32>
    %c0_26 = arith.constant 0 : index
    %c0_27 = arith.constant 0 : index
    %80 = vector.load %arg4[%c0_26, %c0_27] : memref<1x2xf32, #tpu.memory_space<vmem>>, vector<1x2xf32>
    tpu.vector_store %arg4[%c0_26, %c0_27], %79 {strides = array<i32>} : memref<1x2xf32, #tpu.memory_space<vmem>>, vector<1x2xf32>,
    return
  }
  func.func @transform_0(%arg0: i32) -> (i32, i32) {
    %c0_i32 = arith.constant 0 : i32
    %c0_i32_0 = arith.constant 0 : i32
    return %arg0, %c0_i32 : i32, i32
  }
  func.func @transform_1(%arg0: i32) -> (i32, i32) {
    %c0_i32 = arith.constant 0 : i32
    %c0_i32_0 = arith.constant 0 : i32
    %c0_i32_1 = arith.constant 0 : i32
    return %c0_i32, %c0_i32_0 : i32, i32
  }
  func.func @transform_2(%arg0: i32) -> (i32, i32) {
    %c0_i32 = arith.constant 0 : i32
    %c0_i32_0 = arith.constant 0 : i32
    %c0_i32_1 = arith.constant 0 : i32
    return %c0_i32, %c0_i32_0 : i32, i32
  }
  func.func @transform_3(%arg0: i32) -> (i32, i32) {
    %c0_i32 = arith.constant 0 : i32
    %c0_i32_0 = arith.constant 0 : i32
    return %c0_i32, %arg0 : i32, i32
  }
}

</mosaic_0001>

<bundles_post_ra>
// kernel: tpu_custom_call.1
= control target key start
LH: loop header
LB: loop body
LE: loop exit
PB: predicated region body
PF: predicated region fallthrough
CT: control target
= control target key end

     0   :  { %9 = vsyncpa [#allocation4], 0  ;;  %s637_s0 = inlined_call_operand.hbm [shape: f32[2,4096], index: 0, kind: input, shape index: {}]   ;;  %s638_s1 = inlined_call_operand.hbm [shape: f32[1,4096], index: 1, kind: input, shape index: {}]   ;;  %s639_s2 = inlined_call_operand.<no memory space> [shape: f32[1,1], index: 2, kind: input, shape index: {}]   ;;  %s640_s3 = inlined_call_operand.hbm [shape: f32[1,2], index: 3, kind: output, shape index: {}]  }
   0x1   :  { %10 = vsyncpa [#allocation7], 0 }
   0x2   :  { %11 = vsyncpa [#allocation5], 0  ;;  %s504_s12 = smov [#allocation3]   ;;  %s505_s14 = smov [#allocation6]  }
   0x3   :  { %s18_s13 = sshll.u32 %s504_s12, 4  ;;  %s28_s15 = sshll.u32 %s505_s14, 4  ;;  %s19_s13 = int_to_ptr.vmem [resolvable:$true] %s18_s13  ;;  %s29_s15 = int_to_ptr.vmem [resolvable:$true] %s28_s15 }
   0x4   :  { %s432_s18 = scalar_lea.hbm %s637_s0, 1024 }
   0x5   :  { %p433_p0 = scmp.ne.s32.totalorder %s637_s0, %s432_s18  ;;  %p436_p1 = scmp.lt.u32.totalorder %s432_s18, %s637_s0 }
   0x7   :  { %p438_p2 = pnand %p436_p1, %p433_p0 }
   0x9   :  { %441 = shalt.err (!%p438_p2)
}
   0xa   :  { %s442_s23 = scalar_lea.vmem %s19_s13, 1024  ;;  %p447_p4 = scmp.lt.s32.totalorder %s19_s13, %s19_s13 }
   0xb   :  { %p443_p3 = scmp.ne.s32.totalorder %s19_s13, %s442_s23  ;;  %p448_p5 = scmp.lt.s32.totalorder %s442_s23, %s442_s23 }
   0xd   :  { %p449_p6 = por %p448_p5, %p447_p4 }
   0xf   :  { %p450_p7 = pnand %p449_p6, %p443_p3 }
  0x11   :  { %453 = shalt.err (!%p450_p7)
}
  0x12   :  { %21 = dma.hbm_to_vmem [thread:$0]  %s637_s0, 1024, %s19_s13, [#allocation4]  }
  0x13   :  { %s454_s28 = scalar_lea.hbm %s638_s1, 512 }
  0x14   :  { %p455_p8 = scmp.ne.s32.totalorder %s638_s1, %s454_s28  ;;  %p458_p9 = scmp.lt.u32.totalorder %s454_s28, %s638_s1 }
  0x16   :  { %p460_p10 = pnand %p458_p9, %p455_p8 }
  0x18   :  { %463 = shalt.err (!%p460_p10)
}
  0x19   :  { %s464_s6 = scalar_lea.vmem %s29_s15, 512  ;;  %p469_p12 = scmp.lt.s32.totalorder %s29_s15, %s29_s15 }
  0x1a   :  { %p465_p11 = scmp.ne.s32.totalorder %s29_s15, %s464_s6  ;;  %p470_p13 = scmp.lt.s32.totalorder %s464_s6, %s464_s6 }
  0x1c   :  { %p471_p0 = por %p470_p13, %p469_p12 }
  0x1e   :  { %p472_p1 = pnand %p471_p0, %p465_p11 }
  0x20   :  { %475 = shalt.err (!%p472_p1)
}
  0x21   :  { %31 = dma.hbm_to_vmem [thread:$0]  %s638_s1, 512, %s29_s15, [#allocation7]  }
  0x22   :  { %498 = dma.done.wait [#allocation4], 1024  }
  0x23   :  { %499 = vsyncadd [#allocation4], 4294966272 }
  0x24   :  { %500 = dma.done.wait [#allocation7], 512  }
  0x25   :  { %501 = vsyncadd [#allocation7], 4294966784  ;;  %v43_v0 = vlaneseq  ;;  %v506_v1 = vmov 1983009808   ;;  %v41_v9 = vld [vmem:[#allocation6] sm:$0xf] }
  0x26   :  { %v62_v2 = vunpack.c.l.s4 %v506_v1  ;;  %v82_v15 = vld [vmem:[#allocation6 + $0x4] sm:$0xf]  ;;  %v123_v16 = vld [vmem:[#allocation6 + $0x8] sm:$0xf]  ;;  %v164_v21 = vld [vmem:[#allocation6 + $0xc] sm:$0xf] }
  0x27   :  { %v553_v3 = vshrl.u32 %v43_v0, 7  ;;  %v205_v34 = vld [vmem:[#allocation6 + $0x10] sm:$0xf]  ;;  %v40_v35 = vld [vmem:[#allocation3] sm:$0xff]  ;;  %v80_v41 = vld [vmem:[#allocation3 + $0x8] sm:$0xff]  ;;  %vm388_vm0 = vcmask 1041408  }
  0x28   :  { %v63_v4 = vunpack.c.0.s8 %v62_v2  ;;  %v246_v49 = vld [vmem:[#allocation6 + $0x14] sm:$0xf]  ;;  %v287_v63 = vld [vmem:[#allocation6 + $0x18] sm:$0xf]  ;;  %s507_s9 = smov [#allocation8]   ;;  %vm410_vm1 = vcmask 8192  }
  0x29   :  { %v556_v5 = vsub.s32 0, %v553_v3  ;;  %v559_v6 = vsub.s32 1, %v553_v3  ;;  %v562_v7 = vsub.s32 2, %v553_v3  ;;  %v565_v8 = vsub.s32 3, %v553_v3  ;;  %v121_v51 = vld [vmem:[#allocation3 + $0x10] sm:$0xff]  ;;  %s418_s10 = sshll.u32 %s507_s9, 4  ;;  %s419_s10 = int_to_ptr.vmem [resolvable:$true] %s418_s10 }
  0x2a   :  { %v568_v10 = vsub.s32 %v63_v4, %v553_v3  ;;  %v162_v4 = vld [vmem:[#allocation3 + $0x18] sm:$0xff]  ;;  %s476_s11 = scalar_lea.vmem %s419_s10, 16  ;;  %s480_s12 = scalar_lea.vmem %s419_s10, 32 }
  0x2b   :  { %v46_v11 = vrot.slane %v41_v9, %v556_v5  ;;  %v50_v12 = vrot.slane %v41_v9, %v559_v6  ;;  %v54_v13 = vrot.slane %v41_v9, %v562_v7  ;;  %v58_v14 = vrot.slane %v41_v9, %v565_v8  ;;  %p477_p2 = scmp.ne.s32.totalorder %s419_s10, %s476_s11  ;;  %p481_p3 = scmp.lt.s32.totalorder %s419_s10, %s419_s10 }
  0x2c   :  { %v87_v17 = vrot.slane %v82_v15, %v556_v5  ;;  %v91_v18 = vrot.slane %v82_v15, %v559_v6  ;;  %v95_v19 = vrot.slane %v82_v15, %v562_v7  ;;  %v99_v20 = vrot.slane %v82_v15, %v565_v8  ;;  %p482_p4 = scmp.lt.s32.totalorder %s480_s12, %s476_s11 }
  0x2d   :  { %v59_v22 = vcombine.low %v46_v11, %v50_v12  ;;  %v60_v23 = vcombine.low %v54_v13, %v58_v14  ;;  %v128_v24 = vrot.slane %v123_v16, %v556_v5  ;;  %v132_v25 = vrot.slane %v123_v16, %v559_v6 }
  0x2e   :  { %v100_v26 = vcombine.low %v87_v17, %v91_v18  ;;  %v101_v27 = vcombine.low %v95_v19, %v99_v20  ;;  %v136_v28 = vrot.slane %v123_v16, %v562_v7  ;;  %v140_v29 = vrot.slane %v123_v16, %v565_v8  ;;  %v328_v16 = vld [vmem:[#allocation6 + $0x1c] sm:$0xf]  ;;  %p483_p5 = por %p482_p4, %p481_p3 }
  0x2f   :  { %v67_v30 = vrot.slane %v59_v22, %v568_v10  ;;  %v74_v31 = vrot.slane %v60_v23, %v568_v10  ;;  %v141_v32 = vcombine.low %v128_v24, %v132_v25  ;;  %v169_v33 = vrot.slane %v164_v21, %v556_v5  ;;  %v203_v22 = vld [vmem:[#allocation3 + $0x20] sm:$0xff] }
  0x30   :  { %v108_v36 = vrot.slane %v100_v26, %v568_v10  ;;  %v115_v37 = vrot.slane %v101_v27, %v568_v10  ;;  %v142_v38 = vcombine.low %v136_v28, %v140_v29  ;;  %v173_v39 = vrot.slane %v164_v21, %v559_v6  ;;  %p484_p6 = pnand %p483_p5, %p477_p2 }
  0x31   :  { %v75_v40 = vcombine.low %v67_v30, %v74_v31  ;;  %v149_v42 = vrot.slane %v141_v32, %v568_v10  ;;  %v177_v43 = vrot.slane %v164_v21, %v562_v7  ;;  %v181_v44 = vrot.slane %v164_v21, %v565_v8 }
  0x32   :  { %v116_v45 = vcombine.low %v108_v36, %v115_v37  ;;  %v156_v46 = vrot.slane %v142_v38, %v568_v10  ;;  %v182_v47 = vcombine.low %v169_v33, %v173_v39  ;;  %v210_v48 = vrot.slane %v205_v34, %v556_v5 }
  0x33   :  { %v77_v50 = vmul.f32 %v75_v40, %v40_v35  ;;  %v183_v52 = vcombine.low %v177_v43, %v181_v44  ;;  %v214_v53 = vrot.slane %v205_v34, %v559_v6  ;;  %v218_v54 = vrot.slane %v205_v34, %v562_v7  ;;  %v244_v35 = vld [vmem:[#allocation3 + $0x28] sm:$0xff]  ;;  %v285_v44 = vld [vmem:[#allocation3 + $0x30] sm:$0xff] }
  0x34   :  { %v118_v55 = vmul.f32 %v116_v45, %v80_v41  ;;  %v157_v56 = vcombine.low %v149_v42, %v156_v46  ;;  %v190_v57 = vrot.slane %v182_v47, %v568_v10  ;;  %v222_v58 = vrot.slane %v205_v34, %v565_v8  ;;  %v326_v47 = vld [vmem:[#allocation3 + $0x38] sm:$0xff] }
  0x35   :  { %v197_v59 = vrot.slane %v183_v52, %v568_v10  ;;  %v223_v60 = vcombine.low %v210_v48, %v214_v53  ;;  %v251_v61 = vrot.slane %v246_v49, %v556_v5  ;;  %v255_v62 = vrot.slane %v246_v49, %v559_v6 }
  0x36   :  { %v119_v1 = vadd.f32 %v118_v55, %v77_v50  ;;  %v159_v2 = vmul.f32 %v157_v56, %v121_v51  ;;  %v224_v9 = vcombine.low %v218_v54, %v222_v58  ;;  %v259_v11 = vrot.slane %v246_v49, %v562_v7 }
  0x37   :  { %v198_v12 = vcombine.low %v190_v57, %v197_v59  ;;  %v231_v13 = vrot.slane %v223_v60, %v568_v10  ;;  %v263_v14 = vrot.slane %v246_v49, %v565_v8  ;;  %v264_v15 = vcombine.low %v251_v61, %v255_v62 }
  0x38   :  { %v160_v17 = vadd.f32 %v159_v2, %v119_v1  ;;  %v238_v18 = vrot.slane %v224_v9, %v568_v10  ;;  %v292_v19 = vrot.slane %v287_v63, %v556_v5  ;;  %v296_v20 = vrot.slane %v287_v63, %v559_v6 }
  0x39   :  { %v200_v21 = vmul.f32 %v198_v12, %v162_v4  ;;  %v265_v23 = vcombine.low %v259_v11, %v263_v14  ;;  %v272_v24 = vrot.slane %v264_v15, %v568_v10  ;;  %v300_v25 = vrot.slane %v287_v63, %v562_v7 }
  0x3a   :  { %v239_v26 = vcombine.low %v231_v13, %v238_v18  ;;  %v304_v27 = vrot.slane %v287_v63, %v565_v8  ;;  %v305_v28 = vcombine.low %v292_v19, %v296_v20  ;;  %v333_v29 = vrot.slane %v328_v16, %v556_v5 }
  0x3b   :  { %v201_v30 = vadd.f32 %v200_v21, %v160_v17  ;;  %v279_v31 = vrot.slane %v265_v23, %v568_v10  ;;  %v337_v32 = vrot.slane %v328_v16, %v559_v6  ;;  %v341_v33 = vrot.slane %v328_v16, %v562_v7 }
  0x3c   :  { %v241_v34 = vmul.f32 %v239_v26, %v203_v22  ;;  %v306_v36 = vcombine.low %v300_v25, %v304_v27  ;;  %v313_v37 = vrot.slane %v305_v28, %v568_v10  ;;  %v345_v38 = vrot.slane %v328_v16, %v565_v8 }
  0x3d   :  { %v280_v39 = vcombine.low %v272_v24, %v279_v31  ;;  %v346_v40 = vcombine.low %v333_v29, %v337_v32  ;;  %v404_v1 = vand.u32 127, %v43_v0  ;;  %v399_v4 = vstv %s639_s2 }
  0x3e   :  { %v242_v41 = vadd.f32 %v241_v34, %v201_v30  ;;  %v320_v42 = vrot.slane %v306_v36, %v568_v10  ;;  %v347_v5 = vcombine.low %v341_v33, %v345_v38 }
  0x3f   :  { %v282_v43 = vmul.f32 %v280_v39, %v244_v35  ;;  %v354_v45 = vrot.slane %v346_v40, %v568_v10  ;;  %v407_v2 = vsub.s32 %v404_v1, %v553_v3 }
  0x40   :  { %v321_v6 = vcombine.low %v313_v37, %v320_v42  ;;  %v361_v7 = vrot.slane %v347_v5, %v568_v10 }
  0x41   :  { %v283_v46 = vadd.f32 %v282_v43, %v242_v41 }
  0x42   :  { %v323_v48 = vmul.f32 %v321_v6, %v285_v44  ;;  %v362_v49 = vcombine.low %v354_v45, %v361_v7 }
  0x44   :  { %v324_v50 = vadd.f32 %v323_v48, %v283_v46  ;;  %v364_v51 = vmul.f32 %v362_v49, %v326_v47 }
  0x46   :  { %v365_v8 = vadd.f32 %v364_v51, %v324_v50 }
  0x48   :  { %v367_v52 = vcombine.high %v365_v8, %v365_v8  ;;  %v374_v53 = vrot.slane %v365_v8, %v568_v10 }
  0x4a   :  { %v381_v54 = vrot.slane %v367_v52, %v568_v10  ;;  %v382_v55 = vcombine.high %v374_v53, %v374_v53  ;;  %v389_v56 = vsel %vm388_vm0, %v374_v53, 0.0 }
  0x4c   :  { %v383_v57 = vcombine.high %v381_v54, %v381_v54  ;;  %v390_v58 = vsel %vm388_vm0, %v382_v55, 0.0  ;;  %v392_v59 = vsel %vm388_vm0, %v381_v54, 0.0 }
  0x4d   :  { %v391_v60 = vadd.f32 %v390_v58, %v389_v56 }
  0x4e   :  { %v394_v61 = vsel %vm388_vm0, %v383_v57, 0.0 }
  0x4f   :  { %v393_v62 = vadd.f32 %v392_v59, %v391_v60 }
  0x51   :  { %v395_v63 = vadd.f32 %v394_v61, %v393_v62 }
  0x53   :  { %396 = vadd.xlane.f32.xlu0 %v395_v63 }
  0xe0   :  { %v397_v9 = vpop.xlane.xlu0 %396 }
  0xe1   :  { %v400_v10 = vadd.f32 %v399_v4, %v397_v9 }
  0xe3   :  { %v401_v11 = vmax.f32 %v400_v10, 0.0 }
  0xe5   :  { %v408_v12 = vrot.slane %v401_v11, %v407_v2 }
  0xe7   :  { %411 = vst.msk [vmem:[#allocation8] sm:$0x1] %vm410_vm1, %v408_v12 }
  0xe8   :  { %487 = shalt.err (!%p484_p6)
}
  0xe9   :  { %s488_s2 = scalar_lea.hbm %s640_s3, 16 }
  0xea   :  { %p489_p7 = scmp.ne.s32.totalorder %s640_s3, %s488_s2  ;;  %p492_p8 = scmp.lt.u32.totalorder %s488_s2, %s640_s3 }
  0xec   :  { %p494_p9 = pnand %p492_p8, %p489_p7 }
  0xee   :  { %497 = shalt.err (!%p494_p9)
}
  0xef   :  { %421 = dma.vmem_to_hbm [thread:$0]  %s419_s10, 16, %s640_s3, [#allocation5]  }
  0xf0   :  { %502 = dma.done.wait [#allocation5], 16  }
  0xf1   :  { %503 = vsyncadd [#allocation5], 4294967280 }
  0xf2   :  { %425 = vsyncpa [#allocation4], 1 }
  0xf3   :  { %426 = vsyncpa [#allocation7], 1 }
  0xf4   :  { %427 = vsyncpa [#allocation5], 1 }

</bundles_post_ra>
